<compile_context>
chip_gen: v7x
topology: tpu7x:2x2x1
jax: 0.10.0
libtpu: 0.0.40
codegen_flags: <defaults>
</compile_context>

<pallas_src>
import functools

import jax
import jax.numpy as jnp
from jax.experimental import pallas as pl
from jax.experimental.pallas import tpu as pltpu


def _round_up(n, m):
    return ((n + m - 1) // m) * m


# ----------------------------------------------------------------------------
# Kernel: relu(relu(relu(x @ W1' + b1') @ W2 + b2) @ W3 + b3)[:, :hidden]
# Matmuls run bf16 operands on the MXU with f32 accumulation; epilogue in f32;
# single narrow (hidden-wide) store per layer-3 result.
# ----------------------------------------------------------------------------
def subnet_kernel(x_ref, w1_ref, w2_ref, w3_ref, b_ref, out_ref, *, hidden):
    x = x_ref[...].astype(jnp.bfloat16)

    y1 = jnp.dot(x, w1_ref[...], preferred_element_type=jnp.float32)
    y1 = jnp.maximum(y1 + b_ref[0:1, :], 0.0).astype(jnp.bfloat16)

    y2 = jnp.dot(y1, w2_ref[...], preferred_element_type=jnp.float32)
    y2 = jnp.maximum(y2 + b_ref[1:2, :], 0.0).astype(jnp.bfloat16)

    y3 = jnp.dot(y2, w3_ref[...], preferred_element_type=jnp.float32)
    y3 = jnp.maximum(y3 + b_ref[2:3, :], 0.0)

    # Store only the logical hidden columns (masked vst, but 4x fewer HBM bytes
    # than writing the 128-lane padded slab and slicing afterwards).
    out_ref[...] = y3[:, :hidden].astype(out_ref.dtype)


# ----------------------------------------------------------------------------
# One-time parameter transform: fold BN, pad hidden to 128 lanes, cast to bf16.
# ----------------------------------------------------------------------------
def prepare_fused_params(params, *, eps=1e-5, lane=128):
    gamma = params["gamma"].reshape(-1).astype(jnp.float32)
    beta = params["beta"].reshape(-1).astype(jnp.float32)
    mean = params["running_mean"].reshape(-1).astype(jnp.float32)
    var = params["running_var"].reshape(-1).astype(jnp.float32)

    w1 = params["w1"].astype(jnp.float32)
    b1 = params["b1"].reshape(-1).astype(jnp.float32)
    w2 = params["w2"].astype(jnp.float32)
    b2 = params["b2"].reshape(-1).astype(jnp.float32)
    w3 = params["w3"].astype(jnp.float32)
    b3 = params["b3"].reshape(-1).astype(jnp.float32)

    scale = gamma * jax.lax.rsqrt(var + eps)          # (in,)
    shift = beta - mean * scale                       # (in,)
    w1f = scale[:, None] * w1                         # (in, hidden)
    b1f = shift @ w1 + b1                             # (hidden,)

    hidden = w1.shape[1]
    hp = _round_up(hidden, lane)
    pad = hp - hidden

    # Zero padding keeps padded lanes at exactly 0 through every ReLU.
    w1p = jnp.pad(w1f, ((0, 0), (0, pad)))
    w2p = jnp.pad(w2, ((0, pad), (0, pad)))
    w3p = jnp.pad(w3, ((0, pad), (0, pad)))
    b = jnp.stack(
        [jnp.pad(b1f, (0, pad)), jnp.pad(b2, (0, pad)), jnp.pad(b3, (0, pad))],
        axis=0,
    )                                                 # (3, hp) f32

    return {
        "w1": w1p.astype(jnp.bfloat16),
        "w2": w2p.astype(jnp.bfloat16),
        "w3": w3p.astype(jnp.bfloat16),
        "b": b,
        "hidden": hidden,
    }


# ----------------------------------------------------------------------------
# Wrapper: batch-gridded pallas_call with resident weights, lane-slim output.
# ----------------------------------------------------------------------------
def subnet_forward(x, fused, *, block_batch=1024, out_dtype=jnp.bfloat16):
    batch, in_size = x.shape
    hidden = fused["hidden"]
    hidden_pad = fused["w1"].shape[1]

    # Sublane-align the batch and pick a row-tile size.
    bp = _round_up(max(batch, 8), 8)
    tb = min(block_batch, bp)
    # v7x has 2 TensorCores: guarantee >=2 grid steps when the batch allows so
    # the "parallel" axis can shard across both cores (no-op on v5e/v6e).
    if bp // tb < 2 and bp >= 16:
        tb = _round_up(-(-bp // 2), 8)
    bp = _round_up(bp, tb)
    if bp != batch:
        x = jnp.pad(x, ((0, bp - batch), (0, 0)))

    def resident(shape):
        # Constant index_map -> weights/bias stay resident in VMEM across steps.
        return pl.BlockSpec(shape, lambda i: (0,) * len(shape))

    flops = 2 * bp * hidden_pad * (in_size + 2 * hidden_pad)
    bytes_accessed = (
        bp * in_size * x.dtype.itemsize
        + (fused["w1"].size + fused["w2"].size + fused["w3"].size) * 2
        + fused["b"].size * 4
        + bp * hidden * jnp.dtype(out_dtype).itemsize
    )

    out = pl.pallas_call(
        functools.partial(subnet_kernel, hidden=hidden),
        out_shape=jax.ShapeDtypeStruct((bp, hidden), out_dtype),
        grid=(bp // tb,),
        in_specs=[
            pl.BlockSpec((tb, in_size), lambda i: (i, 0)),   # streamed batch tiles
            resident(fused["w1"].shape),
            resident(fused["w2"].shape),
            resident(fused["w3"].shape),
            resident(fused["b"].shape),
        ],
        # Last dim equals the full array dim (hidden) -> legal block shape and
        # no padded output lanes written back to HBM, no post-kernel col slice.
        out_specs=pl.BlockSpec((tb, hidden), lambda i: (i, 0)),
        compiler_params=pltpu.CompilerParams(
            dimension_semantics=("parallel",),
        ),
        cost_estimate=pl.CostEstimate(
            flops=flops, transcendentals=0, bytes_accessed=bytes_accessed
        ),
    )(x, fused["w1"], fused["w2"], fused["w3"], fused["b"])

    # Only a cheap row slice remains, and only when the batch needed padding.
    return out if bp == batch else out[:batch]


# ----------------------------------------------------------------------------
# Parameter init mirroring nn.Linear / nn.BatchNorm1d shapes.
# ----------------------------------------------------------------------------
def init_params(key, in_size, hidden_size):
    k1, k2, k3, k4, k5, k6 = jax.random.split(key, 6)

    def linear_init(kw, kb, fan_in, fan_out):
        bound = 1.0 / jnp.sqrt(jnp.float32(fan_in))
        w = jax.random.uniform(kw, (fan_in, fan_out), jnp.float32, -bound, bound)
        b = jax.random.uniform(kb, (1, fan_out), jnp.float32, -bound, bound)
        return w, b

    w1, b1 = linear_init(k1, k2, in_size, hidden_size)
    w2, b2 = linear_init(k3, k4, hidden_size, hidden_size)
    w3, b3 = linear_init(k5, k6, hidden_size, hidden_size)

    return {
        "gamma": jnp.ones((1, in_size), jnp.float32),
        "beta": jnp.zeros((1, in_size), jnp.float32),
        "running_mean": jnp.zeros((1, in_size), jnp.float32),
        "running_var": jnp.ones((1, in_size), jnp.float32),
        "w1": w1, "b1": b1,
        "w2": w2, "b2": b2,
        "w3": w3, "b3": b3,
    }


# ----------------------------------------------------------------------------
# References.
# ----------------------------------------------------------------------------
def subnet_reference(x, p):
    """Pure-JAX f32 reference of the original module semantics (eval mode)."""
    eps = 1e-5
    normed = (x - p["running_mean"]) * jax.lax.rsqrt(p["running_var"] + eps)
    normed = normed * p["gamma"] + p["beta"]
    y1 = jnp.maximum(normed @ p["w1"] + p["b1"], 0.0)
    y2 = jnp.maximum(y1 @ p["w2"] + p["b2"], 0.0)
    y3 = jnp.maximum(y2 @ p["w3"] + p["b3"], 0.0)
    return y3


def subnet_reference_fused(x, fused, *, out_dtype=jnp.bfloat16):
    """Mirror of the kernel's numerics (bf16 operands, f32 acc, bf16 store)."""
    def mm(a, w):
        return jnp.dot(a.astype(jnp.bfloat16).astype(jnp.float32),
                       w.astype(jnp.float32),
                       preferred_element_type=jnp.float32)
    b = fused["b"]
    y1 = jnp.maximum(mm(x, fused["w1"]) + b[0:1], 0.0)
    y2 = jnp.maximum(mm(y1, fused["w2"]) + b[1:2], 0.0)
    y3 = jnp.maximum(mm(y2, fused["w3"]) + b[2:3], 0.0)
    return y3[:, :fused["hidden"]].astype(out_dtype)


if __name__ == "__main__":
    key = jax.random.PRNGKey(0)
    k_x, k_p = jax.random.split(key)

    batch, in_size, hidden_size = 16, 16, 32
    x = jax.random.normal(k_x, (batch, in_size), jnp.float32)
    params = init_params(k_p, in_size, hidden_size)

    # One-time param transform (BN fold + lane padding + bf16 cast).
    fused = prepare_fused_params(params)

    out = subnet_forward(x, fused)          # bf16 output, 2-step parallel grid
    out = jax.block_until_ready(out)

    assert out.shape == (batch, hidden_size)
    assert out.dtype == jnp.bfloat16

    # Check vs. a reference mirroring the kernel's bf16/f32 numerics
    # (tolerance covers one-ulp bf16 rounding differences at the store).
    ref_exact = subnet_reference_fused(x, fused).astype(jnp.float32)
    assert jnp.allclose(out.astype(jnp.float32), ref_exact, atol=2e-2, rtol=2e-2), \
        "Pallas output mismatch vs bf16-mirrored reference"

    # Loose check vs. the original full-f32 module semantics.
    ref_f32 = subnet_reference(x, params)
    assert jnp.allclose(out.astype(jnp.float32), ref_f32, atol=5e-2, rtol=5e-2), \
        "Pallas output mismatch vs f32 module reference"

    # TODO(synk): training-mode Dropout / batch-stat BatchNorm not implemented
    # (would need pltpu.prng_seed/prng_random_bits and a batch-stat reduction).

    print("KERNEL_OK")
</pallas_src>

<mosaic_0001>
module attributes {stable_mosaic.version = 11 : i64} {
  func.func @subnet_kernel(%arg0: i32, %arg1: memref<8x16xf32, #tpu.memory_space<vmem>>, %arg2: memref<16x128xbf16, #tpu.memory_space<vmem>>, %arg3: memref<128x128xbf16, #tpu.memory_space<vmem>>, %arg4: memref<128x128xbf16, #tpu.memory_space<vmem>>, %arg5: memref<3x128xf32, #tpu.memory_space<vmem>>, %arg6: memref<8x32xbf16, #tpu.memory_space<vmem>>) attributes {dimension_semantics = [#tpu.dimension_semantics<parallel>], iteration_bounds = array<i64: 2>, scalar_prefetch = 0 : i64, scratch_operands = 0 : i64, tpu.core_type = #tpu.core_type<tc>, window_params = [{transform_indices = @transform_0, window_bounds = array<i64: 8, 16>}, {pipeline_mode = #tpu.pipeline_mode<synchronous>, transform_indices = @transform_1, window_bounds = array<i64: 16, 128>}, {pipeline_mode = #tpu.pipeline_mode<synchronous>, transform_indices = @transform_2, window_bounds = array<i64: 128, 128>}, {pipeline_mode = #tpu.pipeline_mode<synchronous>, transform_indices = @transform_3, window_bounds = array<i64: 128, 128>}, {pipeline_mode = #tpu.pipeline_mode<synchronous>, transform_indices = @transform_4, window_bounds = array<i64: 3, 128>}, {transform_indices = @transform_5, window_bounds = array<i64: 8, 32>}]} {
    %c0 = arith.constant 0 : index
    %c0_0 = arith.constant 0 : index
    %0 = vector.load %arg1[%c0, %c0_0] : memref<8x16xf32, #tpu.memory_space<vmem>>, vector<8x16xf32>
    %1 = arith.truncf %0 : vector<8x16xf32> to vector<8x16xbf16>
    %c0_1 = arith.constant 0 : index
    %c0_2 = arith.constant 0 : index
    %2 = vector.load %arg2[%c0_1, %c0_2] : memref<16x128xbf16, #tpu.memory_space<vmem>>, vector<16x128xbf16>
    %cst = arith.constant dense<0.000000e+00> : vector<8x128xf32>
    %3 = tpu.matmul %1, %2, %cst {dimension_numbers = #tpu.dot_dimension_numbers<[1], [0], [0], [1], [0, 0, 1, 1], [], []>} : vector<8x16xbf16>, vector<16x128xbf16>, vector<8x128xf32> -> vector<8x128xf32>
    %c0_3 = arith.constant 0 : index
    %c0_4 = arith.constant 0 : index
    %4 = vector.load %arg5[%c0_3, %c0_4] : memref<3x128xf32, #tpu.memory_space<vmem>>, vector<1x128xf32>
    %5 = vector.broadcast %4 : vector<1x128xf32> to vector<8x128xf32>
    %6 = arith.addf %3, %5 : vector<8x128xf32>
    %cst_5 = arith.constant 0.000000e+00 : f32
    %7 = vector.broadcast %cst_5 : f32 to vector<8x128xf32>
    %8 = arith.maximumf %6, %7 : vector<8x128xf32>
    %9 = arith.truncf %8 : vector<8x128xf32> to vector<8x128xbf16>
    %c0_6 = arith.constant 0 : index
    %c0_7 = arith.constant 0 : index
    %10 = vector.load %arg3[%c0_6, %c0_7] : memref<128x128xbf16, #tpu.memory_space<vmem>>, vector<128x128xbf16>
    %cst_8 = arith.constant dense<0.000000e+00> : vector<8x128xf32>
    %11 = tpu.matmul %9, %10, %cst_8 {dimension_numbers = #tpu.dot_dimension_numbers<[1], [0], [0], [1], [0, 0, 1, 1], [], []>} : vector<8x128xbf16>, vector<128x128xbf16>, vector<8x128xf32> -> vector<8x128xf32>
    %c1 = arith.constant 1 : index
    %c0_9 = arith.constant 0 : index
    %12 = vector.load %arg5[%c1, %c0_9] : memref<3x128xf32, #tpu.memory_space<vmem>>, vector<1x128xf32>
    %13 = vector.broadcast %12 : vector<1x128xf32> to vector<8x128xf32>
    %14 = arith.addf %11, %13 : vector<8x128xf32>
    %cst_10 = arith.constant 0.000000e+00 : f32
    %15 = vector.broadcast %cst_10 : f32 to vector<8x128xf32>
    %16 = arith.maximumf %14, %15 : vector<8x128xf32>
    %17 = arith.truncf %16 : vector<8x128xf32> to vector<8x128xbf16>
    %c0_11 = arith.constant 0 : index
    %c0_12 = arith.constant 0 : index
    %18 = vector.load %arg4[%c0_11, %c0_12] : memref<128x128xbf16, #tpu.memory_space<vmem>>, vector<128x128xbf16>
    %cst_13 = arith.constant dense<0.000000e+00> : vector<8x128xf32>
    %19 = tpu.matmul %17, %18, %cst_13 {dimension_numbers = #tpu.dot_dimension_numbers<[1], [0], [0], [1], [0, 0, 1, 1], [], []>} : vector<8x128xbf16>, vector<128x128xbf16>, vector<8x128xf32> -> vector<8x128xf32>
    %c2 = arith.constant 2 : index
    %c0_14 = arith.constant 0 : index
    %20 = vector.load %arg5[%c2, %c0_14] : memref<3x128xf32, #tpu.memory_space<vmem>>, vector<1x128xf32>
    %21 = vector.broadcast %20 : vector<1x128xf32> to vector<8x128xf32>
    %22 = arith.addf %19, %21 : vector<8x128xf32>
    %cst_15 = arith.constant 0.000000e+00 : f32
    %23 = vector.broadcast %cst_15 : f32 to vector<8x128xf32>
    %24 = arith.maximumf %22, %23 : vector<8x128xf32>
    %25 = vector.extract_strided_slice %24 {offsets = [0, 0], sizes = [8, 32], strides = [1, 1]} : vector<8x128xf32> to vector<8x32xf32>
    %26 = arith.truncf %25 : vector<8x32xf32> to vector<8x32xbf16>
    %c0_16 = arith.constant 0 : index
    %c0_17 = arith.constant 0 : index
    %27 = vector.load %arg6[%c0_16, %c0_17] : memref<8x32xbf16, #tpu.memory_space<vmem>>, vector<8x32xbf16>
    tpu.vector_store %arg6[%c0_16, %c0_17], %26 {strides = array<i32>} : memref<8x32xbf16, #tpu.memory_space<vmem>>, vector<8x32xbf16>,
    return
  }
  func.func @transform_0(%arg0: i32) -> (i32, i32) {
    %c0_i32 = arith.constant 0 : i32
    %c0_i32_0 = arith.constant 0 : i32
    return %arg0, %c0_i32 : i32, i32
  }
  func.func @transform_1(%arg0: i32) -> (i32, i32) {
    %c0_i32 = arith.constant 0 : i32
    %c0_i32_0 = arith.constant 0 : i32
    %c0_i32_1 = arith.constant 0 : i32
    return %c0_i32, %c0_i32_0 : i32, i32
  }
  func.func @transform_2(%arg0: i32) -> (i32, i32) {
    %c0_i32 = arith.constant 0 : i32
    %c0_i32_0 = arith.constant 0 : i32
    %c0_i32_1 = arith.constant 0 : i32
    return %c0_i32, %c0_i32_0 : i32, i32
  }
  func.func @transform_3(%arg0: i32) -> (i32, i32) {
    %c0_i32 = arith.constant 0 : i32
    %c0_i32_0 = arith.constant 0 : i32
    %c0_i32_1 = arith.constant 0 : i32
    return %c0_i32, %c0_i32_0 : i32, i32
  }
  func.func @transform_4(%arg0: i32) -> (i32, i32) {
    %c0_i32 = arith.constant 0 : i32
    %c0_i32_0 = arith.constant 0 : i32
    %c0_i32_1 = arith.constant 0 : i32
    return %c0_i32, %c0_i32_0 : i32, i32
  }
  func.func @transform_5(%arg0: i32) -> (i32, i32) {
    %c0_i32 = arith.constant 0 : i32
    %c0_i32_0 = arith.constant 0 : i32
    return %arg0, %c0_i32 : i32, i32
  }
}

</mosaic_0001>

<bundles_post_ra>
// kernel: tpu_custom_call.1
= control target key start
LH: loop header
LB: loop body
LE: loop exit
PB: predicated region body
PF: predicated region fallthrough
CT: control target
= control target key end

     0   :  { %10 = vsyncpa [#allocation3], 0  ;;  %s1408_s0 = inlined_call_operand.hbm [shape: f32[16,16], index: 0, kind: input, shape index: {}]   ;;  %s1409_s1 = inlined_call_operand.hbm [shape: bf16[16,128], index: 1, kind: input, shape index: {}]   ;;  %s1410_s2 = inlined_call_operand.hbm [shape: bf16[128,128], index: 2, kind: input, shape index: {}]   ;;  %s1411_s3 = inlined_call_operand.hbm [shape: bf16[128,128], index: 3, kind: input, shape index: {}]   ;;  %s1412_s4 = inlined_call_operand.vmem [shape: f32[3,128], index: 4, kind: input, shape index: {}]   ;;  %s1413_s5 = inlined_call_operand.hbm [shape: bf16[16,32], index: 5, kind: output, shape index: {}]  }
   0x1   :  { %12 = vsyncpa [#allocation3 + $0x1], 0 }
   0x2   :  { %13 = vsyncpa [#allocation6], 0 }
   0x3   :  { %14 = vsyncpa [#allocation9], 0 }
   0x4   :  { %15 = vsyncpa [#allocation4], 0 }
   0x5   :  { %17 = vsyncpa [#allocation4 + $0x1], 0  ;;  %s1115_s18 = smov 0   ;;  %s1117_s19 = smov 0  }
   0x6   :  { %s1119_s20 = smov 0   ;;  %s1121_s21 = smov 0  }
   0x7 LB: > { %s1136_s22 = sadd.s32 4294967295, %s1074_s21   ;;  %s683_s23 = sadd.s32 4294967294, %s1074_s21   ;;  %s1074_s21 = sphi %s1121_s21, %s1436_s21   ;;  %s1070_s20 = sphi %s1119_s20, %s1435_s20   ;;  %s1066_s19 = sphi %s1117_s19, %s1434_s19   ;;  %s1062_s18 = sphi %s1115_s18, %s1433_s18  }
   0x8   : > { %p43_p0 = scmp.ne.s32.totalorder %s1066_s19, %s1062_s18  ;;  %p1414_p1 = scmp.eq.s32.totalorder %s1136_s22, 0 }
   0x9   : > { %p157_p3 = scmp.eq.s32.totalorder %s683_s23, 1  ;;  %p684_p5 = scmp.ge.s32.totalorder %s1074_s21, 1 }
   0xa   : > { %p1145_p4 = por %p1414_p1, %p43_p0  ;;  %p164_p7 = scmp.lt.s32.totalorder %s1074_s21, 3 }
   0xb   : > { %p1150_p6 = por %p157_p3, %p43_p0  ;;  %s1076_s27 = smov [#allocation5]  }
   0xc   : > { %s1417_s24 = scalar_select %p1145_p4, 1, 0 }
   0xd   : > { %s1418_s25 = scalar_select %p1150_p6, 1, 0 }
   0xe   : > { %p1155_p8 = pnand %p684_p5, %p164_p7  ;;  %s176_s28 = sshll.u32 %s1076_s27, 4  ;;  %s1159_s28 = int_to_ptr.vmem [resolvable:$true] %s176_s28 }
   0xf   : > { %s1077_s30 = smov [#allocation7]   ;;  %s1078_s7 = smov [#allocation8]  }
  0x10   : > { %s1419_s26 = scalar_select %p1155_p8, 1, 0 }
  0x11   : > { %p804_p9 = pneg %p1155_p8  ;;  %s189_s6 = sshll.u32 %s1077_s30, 4  ;;  %s1170_s6 = int_to_ptr.vmem [resolvable:$true] %s189_s6 }
  0x12   : > { %s1172_s8 = sshll.u32 %s1078_s7, 4  ;;  %s886_s11 = scalar_lea.hbm %s1409_s1, 128  ;;  %s203_s8 = int_to_ptr.vmem [resolvable:$true] %s1172_s8 }
  0x13   : > { %p1166_p11 = pnand %p804_p9, %p1414_p1  ;;  %p887_p12 = scmp.ne.s32.totalorder %s1409_s1, %s886_s11 }
  0x14   : > { %p893_p5 = scmp.lt.u32.totalorder %s886_s11, %s1409_s1 }
  0x15   : > { %p1182_p13 = pneg %p1166_p11 }
  0x17   : > { %p889_p0 = pnand %p1182_p13, %p887_p12 }
  0x19   : > { %p890_p3 = pneg %p889_p0 }
  0x1b   : > { %p895_p7 = pnand %p893_p5, %p890_p3 }
  0x1d   : > { %898 = shalt.err (!%p895_p7)
}
  0x1e   : > { %s899_s17 = scalar_lea.vmem %s1159_s28, 128  ;;  %p907_p2 = scmp.lt.s32.totalorder %s1159_s28, %s1159_s28 }
  0x1f   : > { %p900_p9 = scmp.ne.s32.totalorder %s1159_s28, %s899_s17  ;;  %p908_p6 = scmp.lt.s32.totalorder %s899_s17, %s899_s17 }
  0x21   : > { %p902_p10 = pnand %p900_p9, %p1182_p13  ;;  %p909_p12 = por %p908_p6, %p907_p2 }
  0x23   : > { %p903_p1 = pneg %p902_p10 }
  0x25   : > { %p910_p0 = pnand %p909_p12, %p903_p1 }
  0x27   : > { %913 = shalt.err (!%p910_p0)
}
  0x28   : > { %s1079_s23 = smov 64   ;;  %s1080_s27 = smov 4  }
  0x29   : > { %807 = dma.hbm_to_vmem [thread:$0]  (!%p1166_p11), %s1409_s1, 128, %s1159_s28, [#allocation6], %s1079_s23, %s1079_s23, %s1080_s27  }
  0x2a   : > { %s914_s11 = scalar_lea.hbm %s1410_s2, 1024 }
  0x2b   : > { %p915_p1 = scmp.ne.s32.totalorder %s1410_s2, %s914_s11  ;;  %p921_p10 = scmp.lt.u32.totalorder %s914_s11, %s1410_s2 }
  0x2d   : > { %p917_p2 = pnand %p915_p1, %p1182_p13 }
  0x2f   : > { %p918_p6 = pneg %p917_p2 }
  0x31   : > { %p923_p3 = pnand %p921_p10, %p918_p6 }
  0x33   : > { %926 = shalt.err (!%p923_p3)
}
  0x34   : > { %s927_s28 = scalar_lea.vmem %s1170_s6, 1024  ;;  %p935_p12 = scmp.lt.s32.totalorder %s1170_s6, %s1170_s6 }
  0x35   : > { %p928_p5 = scmp.ne.s32.totalorder %s1170_s6, %s927_s28  ;;  %p936_p0 = scmp.lt.s32.totalorder %s927_s28, %s927_s28 }
  0x37   : > { %p930_p7 = pnand %p928_p5, %p1182_p13  ;;  %p937_p1 = por %p936_p0, %p935_p12 }
  0x39   : > { %p931_p9 = pneg %p930_p7 }
  0x3b   : > { %p938_p2 = pnand %p937_p1, %p931_p9 }
  0x3d   : > { %941 = shalt.err (!%p938_p2)
}
  0x3e   : > { %810 = dma.hbm_to_vmem [thread:$0]  (!%p1166_p11), %s1410_s2, 1024, %s1170_s6, [#allocation6], %s1079_s23, %s1079_s23, %s1080_s27  }
  0x3f   : > { %s942_s10 = scalar_lea.hbm %s1411_s3, 1024 }
  0x40   : > { %p943_p6 = scmp.ne.s32.totalorder %s1411_s3, %s942_s10  ;;  %p949_p5 = scmp.lt.u32.totalorder %s942_s10, %s1411_s3 }
  0x42   : > { %p945_p10 = pnand %p943_p6, %p1182_p13 }
  0x44   : > { %p946_p3 = pneg %p945_p10 }
  0x46   : > { %p951_p7 = pnand %p949_p5, %p946_p3 }
  0x48   : > { %954 = shalt.err (!%p951_p7)
}
  0x49   : > { %s955_s16 = scalar_lea.vmem %s203_s8, 1024  ;;  %p963_p1 = scmp.lt.s32.totalorder %s203_s8, %s203_s8 }
  0x4a   : > { %p956_p9 = scmp.ne.s32.totalorder %s203_s8, %s955_s16  ;;  %p964_p2 = scmp.lt.s32.totalorder %s955_s16, %s955_s16 }
  0x4c   : > { %p958_p12 = pnand %p956_p9, %p1182_p13  ;;  %p965_p4 = por %p964_p2, %p963_p1 }
  0x4e   : > { %p959_p0 = pneg %p958_p12 }
  0x50   : > { %p966_p8 = pnand %p965_p4, %p959_p0 }
  0x52   : > { %969 = shalt.err (!%p966_p8)
}
  0x53   : > { %813 = dma.hbm_to_vmem [thread:$0]  (!%p1166_p11), %s1411_s3, 1024, %s203_s8, [#allocation9], %s1079_s23, %s1079_s23, %s1080_s27  }
  0x54   : > { %s1255_s14 = sadd.s32 1, %s1074_s21   ;;  %s30_s17 = sadd.s32 1, %s1070_s20 }
  0x55   : > { %s27_s29 = ssub.s32 %s1074_s21, %s1255_s14  ;;  %p37_p8 = scmp.ne.s32.totalorder %s1070_s20, %s1066_s19 }
  0x56   : > { %p28_p4 = scmp.eq.s32.totalorder %s27_s29, 0  ;;  %p38_p13 = scmp.eq.s32.totalorder %s1074_s21, 0 }
  0x57   : > { %p825_p6 = scmp.lt.s32.totalorder %s1074_s21, 2  ;;  %p1422_p3 = scmp.eq.s32.totalorder %s1136_s22, 1 }
  0x58   : > { %s1265_s30 = scalar_select %p28_p4, %s1070_s20, %s30_s17  }
  0x59   : > { %p39_p10 = por %p38_p13, %p37_p8  ;;  %p1269_p5 = por %p1422_p3, %p37_p8 }
  0x5a   : > { %s219_s9 = sand.u32 1, %s1070_s20   ;;  %s690_s10 = sshll.u32 %s1074_s21, 7 }
  0x5b   : > { %s689_s8 = sshll.u32 %s219_s9, 3  ;;  %s1278_s11 = scalar_lea.hbm %s1408_s0, %s690_s10 }
  0x5c   : > { %s223_s12 = scalar_lea.vmem [#allocation2], %s689_s8  ;;  %p1280_p11 = pnand %p825_p6, %p39_p10 }
  0x5d   : > { %s230_s13 = sshll.u32 %s223_s12, 4  ;;  %s220_s16 = scalar_lea.sflag [#allocation3], %s219_s9  ;;  %s1284_s13 = int_to_ptr.vmem [resolvable:$true] %s230_s13 }
  0x5e   : > { %s970_s6 = scalar_lea.hbm %s1278_s11, 128  ;;  %p972_p9 = pneg %p1280_p11 }
  0x5f   : > { %p971_p7 = scmp.ne.s32.totalorder %s1278_s11, %s970_s6  ;;  %s975_s17 = scalar_lea.hbm %s1408_s0, 256 }
  0x60   : > { %p976_p1 = scmp.lt.u32.totalorder %s1278_s11, %s1408_s0  ;;  %p977_p2 = scmp.lt.u32.totalorder %s975_s17, %s970_s6 }
  0x61   : > { %p973_p12 = pnand %p972_p9, %p971_p7  ;;  %p979_p8 = scmp.lt.u32.totalorder %s970_s6, %s1278_s11 }
  0x62   : > { %p978_p4 = por %p977_p2, %p976_p1 }
  0x63   : > { %p974_p0 = pneg %p973_p12 }
  0x64   : > { %p980_p13 = por %p979_p8, %p978_p4 }
  0x66   : > { %p981_p6 = pnand %p980_p13, %p974_p0 }
  0x68   : > { %984 = shalt.err (!%p981_p6)
}
  0x69   : > { %s985_s9 = scalar_lea.vmem %s1284_s13, 128  ;;  %s1081_s23 = smov [#allocation2]  }
  0x6a   : > { %p986_p10 = scmp.ne.s32.totalorder %s1284_s13, %s985_s9  ;;  %s990_s27 = sshll.u32 %s1081_s23, 4  ;;  %s991_s27 = int_to_ptr.vmem [resolvable:$false] %s990_s27 }
  0x6b   : > { %s992_s12 = scalar_lea.vmem %s991_s27, 256  ;;  %p993_p12 = scmp.lt.s32.totalorder %s1284_s13, %s991_s27 }
  0x6c   : > { %p988_p3 = pnand %p986_p10, %p972_p9  ;;  %p994_p1 = scmp.lt.s32.totalorder %s992_s12, %s985_s9 }
  0x6e   : > { %p989_p7 = pneg %p988_p3  ;;  %p995_p2 = por %p994_p1, %p993_p12 }
  0x70   : > { %p996_p4 = pnand %p995_p2, %p989_p7 }
  0x72   : > { %999 = shalt.err (!%p996_p4)
}
  0x73   : > { %817 = dma.hbm_to_vmem [thread:$0]  (!%p1280_p11), %s1278_s11, 128, %s1284_s13, %s220_s16  }
  0x74   : > { %p1425_p0 = scmp.ne.s32.totalorder %s1419_s26, 0 }
  0x75   : > { %s1314_s6 = sand.u32 (!%p1425_p0), 1, %s1066_s19   ;;  %p1426_p9 = scmp.ne.s32.totalorder (!%p1425_p0), %s1417_s24, 0 }
  0x76   : > { %239 = sbr.rel (%p1425_p0) target bundleno = 806 (0x326), region = 40  ;;  %s692_s28 = sshll.u32 (!%p1425_p0), %s1314_s6, 3 }
  0x77   : > { %s242_s29 = scalar_lea.sflag (!%p1425_p0), [#allocation3], %s1314_s6  ;;  %s245_s17 = scalar_lea.vmem (!%p1425_p0), [#allocation2], %s692_s28 }
  0x7d   : > { %1045 = dma.done.wait (%p1426_p9), %s242_s29, 128  }
  0x7e   : > { %1047 = vsyncadd (%p1426_p9), %s242_s29, 4294967168  ;;  %p1427_p8 = scmp.eq.s32.totalorder %s1136_s22, 0 }
  0x80   : > { %1049 = dma.done.wait (%p1427_p8), [#allocation6], 1152   ;;  %p1428_p11 = pmov %p1427_p8 }
  0x81   : > { %p1429_p13 = pmov %p1427_p8 }
  0x82   : > { %1051 = vsyncadd (%p1428_p11), [#allocation6], 4294966144 }
  0x83   : > { %1053 = dma.done.wait (%p1429_p13), [#allocation9], 1024   ;;  %p1430_p6 = pmov %p1427_p8 }
  0x84   : > { %v1082_v0 = vmov 0.0   ;;  %vm1083_vm0 = vmmov 0   ;;  %v869_v1 = vld [vmem:[#allocation5] sm:$0xff]   ;;  %v285_v2 = vld [vmem:[%s245_s17] sm:$0xff]  ;;  %vm300_vm1 = vcmask 130048   ;;  %v870_v4 = vld [vmem:[#allocation7] sm:$0xff]  }
  0x85   : > { %1055 = vsyncadd (%p1430_p6), [#allocation9], 4294966272  ;;  %742 = vmatprep.subr.bf16.mxu0 %v1082_v0  ;;  %744 = vmatprep.mubr.msk.bf16.mxu0 %vm1083_vm0, %v1082_v0  ;;  %v286_v3 = vpack.c.bf16 %v285_v2, %v285_v2  ;;  %v871_v5 = vld [vmem:[#allocation7 + $0x8] sm:$0xff]   ;;  %v872_v6 = vld [vmem:[#allocation7 + $0x10] sm:$0xff]   ;;  %s696_s15 = sshll.u32 %s1314_s6, 2  ;;  %s719_s8 = sshll.u32 %s1136_s22, 6 }
  0x86   : > { %748 = vmatprep.subr.bf16.mxu1 %v1082_v0  ;;  %764 = vmatprep.mubr.msk.bf16.mxu1 %vm1083_vm0, %v1082_v0  ;;  %v873_v7 = vld [vmem:[#allocation7 + $0x18] sm:$0xff]   ;;  %v874_v8 = vld [vmem:[#allocation7 + $0x20] sm:$0xff]   ;;  %v875_v9 = vld [vmem:[#allocation7 + $0x28] sm:$0xff]   ;;  %s283_s9 = scalar_lea.vmem [#allocation10], %s696_s15  ;;  %vm568_vm2 = vcmask 257024   ;;  %s1364_s28 = scalar_lea.hbm %s1413_s5, %s719_s8 }
  0x87   : > { %743 = vmatpush3.bf16.msra.mxu0 %v869_v1  ;;  %749 = vmatpush3.bf16.msra.mxu1 %v870_v4  ;;  %v876_v10 = vld [vmem:[#allocation7 + $0x30] sm:$0xff]   ;;  %v877_v11 = vld [vmem:[#allocation7 + $0x38] sm:$0xff]   ;;  %v878_v12 = vld [vmem:[#allocation8] sm:$0xff]   ;;  %s584_s23 = sshll.u32 %s283_s9, 4  ;;  %s571_s29 = scalar_lea.sflag [#allocation4], %s1314_s6  ;;  %s1366_s23 = int_to_ptr.vmem [resolvable:$true] %s584_s23 }
  0x88   : > { %768 = vmatprep.subr.bf16.mxu0 %v1082_v0  ;;  %750 = vmatprep.subr.bf16.mxu1 %v1082_v0  ;;  %v879_v13 = vld [vmem:[#allocation8 + $0x8] sm:$0xff]   ;;  %v880_v14 = vld [vmem:[#allocation8 + $0x10] sm:$0xff]   ;;  %v881_v15 = vld [vmem:[#allocation8 + $0x18] sm:$0xff]   ;;  %s1000_s17 = scalar_lea.vmem %s1366_s23, 64  ;;  %s1084_s22 = smov [#allocation10]  }
  0x89   : > { %v882_v16 = vld [vmem:[#allocation8 + $0x20] sm:$0xff]   ;;  %v883_v17 = vld [vmem:[#allocation8 + $0x28] sm:$0xff]   ;;  %v884_v26 = vld [vmem:[#allocation8 + $0x30] sm:$0xff]   ;;  %p1001_p10 = scmp.ne.s32.totalorder %s1366_s23, %s1000_s17  ;;  %s1004_s24 = sshll.u32 %s1084_s22, 4  ;;  %s1005_s24 = int_to_ptr.vmem [resolvable:$false] %s1004_s24 }
  0x8a   : > { %745 = vmatmul.mubr.msk.bf16.vlgmr.msra.gmra.mrb[0].mxu0 %vm300_vm1, %v286_v3  ;;  %v697_v18 = vld [vmem:[%s1412_s4] ss:$0 sm:$0xff]  ;;  %v885_v27 = vld [vmem:[#allocation8 + $0x38] sm:$0xff]   ;;  %v700_v28 = vld [vmem:[%s1412_s4 + $0x1] ss:$0 sm:$0xff]  ;;  %s1006_s26 = scalar_lea.vmem %s1005_s24, 128  ;;  %p1007_p12 = scmp.lt.s32.totalorder %s1366_s23, %s1005_s24 }
  0x8b   : > { %784 = vmatprep.mubr.msk.bf16.mxu0 %vm1083_vm0, %v1082_v0  ;;  %751 = vmatpush3.bf16.msra.mxu1 %v871_v5  ;;  %v709_v36 = vld [vmem:[%s1412_s4 + $0x2] ss:$0 sm:$0xff]  ;;  %p1002_p3 = pnand %p1001_p10, %p1269_p5  ;;  %p1008_p1 = scmp.lt.s32.totalorder %s1006_s26, %s1000_s17 }
  0x8c   : > { %752 = vmatprep.subr.bf16.mxu1 %v1082_v0  ;;  %769 = vmatpush3.bf16.msra.mxu0 %v878_v12 }
  0x8d   : > { %770 = vmatprep.subr.bf16.mxu0 %v1082_v0  ;;  %p1003_p7 = pneg %p1002_p3  ;;  %p1009_p2 = por %p1008_p1, %p1007_p12 }
  0x8f   : > { %753 = vmatpush3.bf16.msra.mxu1 %v872_v6  ;;  %p1010_p4 = pnand %p1009_p2, %p1003_p7 }
  0x90   : > { %754 = vmatprep.subr.bf16.mxu1 %v1082_v0  ;;  %771 = vmatpush3.bf16.msra.mxu0 %v879_v13 }
  0x91   : > { %772 = vmatprep.subr.bf16.mxu0 %v1082_v0 }
  0x93   : > { %755 = vmatpush3.bf16.msra.mxu1 %v873_v7 }
  0x94   : > { %756 = vmatprep.subr.bf16.mxu1 %v1082_v0  ;;  %773 = vmatpush3.bf16.msra.mxu0 %v880_v14 }
  0x95   : > { %774 = vmatprep.subr.bf16.mxu0 %v1082_v0 }
  0x97   : > { %757 = vmatpush3.bf16.msra.mxu1 %v874_v8 }
  0x98   : > { %758 = vmatprep.subr.bf16.mxu1 %v1082_v0  ;;  %775 = vmatpush3.bf16.msra.mxu0 %v881_v15 }
  0x99   : > { %776 = vmatprep.subr.bf16.mxu0 %v1082_v0 }
  0x9b   : > { %759 = vmatpush3.bf16.msra.mxu1 %v875_v9 }
  0x9c   : > { %760 = vmatprep.subr.bf16.mxu1 %v1082_v0  ;;  %777 = vmatpush3.bf16.msra.mxu0 %v882_v16 }
  0x9d   : > { %778 = vmatprep.subr.bf16.mxu0 %v1082_v0 }
  0x9f   : > { %761 = vmatpush3.bf16.msra.mxu1 %v876_v10 }
  0xa0   : > { %762 = vmatprep.subr.bf16.mxu1 %v1082_v0  ;;  %779 = vmatpush3.bf16.msra.mxu0 %v883_v17 }
  0xa1   : > { %780 = vmatprep.subr.bf16.mxu0 %v1082_v0 }
  0xa3   : > { %763 = vmatpush3.bf16.msra.mxu1 %v877_v11 }
  0xa4   : > { %781 = vmatpush3.bf16.msra.mxu0 %v884_v26 }
  0xa5   : > { %782 = vmatprep.subr.bf16.mxu0 %v1082_v0 }
  0xa8   : > { %783 = vmatpush3.bf16.msra.mxu0 %v885_v27 }
 0x15d   : > { %v338_v19 = vpop.f32.mrb[0].mxu0 }
 0x15e   : > { %v339_v20 = vadd.f32 %v697_v18, %v338_v19  ;;  %v746_v21 = vpop.f32.mrb[1].mxu0 }
 0x15f   : > { %v341_v22 = vpop.f32.mrb[2].mxu0 }
 0x160   : > { %v344_v23 = vmax.f32 %v339_v20, 0.0  ;;  %v747_v24 = vpop.f32.mrb[3].mxu0 }
 0x162   : > { %v345_v25 = vpack.c.bf16 %v344_v23, %v344_v23 }
 0x164   : > { %765 = vmatmul.mubr.bf16.vlgmr.msra.gmra.mrb[0].mxu1 %v345_v25 }
 0x237   : > { %v449_v29 = vpop.f32.mrb[0].mxu1 }
 0x238   : > { %v450_v30 = vadd.f32 %v700_v28, %v449_v29  ;;  %v766_v31 = vpop.f32.mrb[1].mxu1 }
 0x239   : > { %v452_v32 = vpop.f32.mrb[2].mxu1 }
 0x23a   : > { %v455_v33 = vmax.f32 %v450_v30, 0.0  ;;  %v767_v34 = vpop.f32.mrb[3].mxu1 }
 0x23c   : > { %v456_v35 = vpack.c.bf16 %v455_v33, %v455_v33 }
 0x23e   : > { %785 = vmatmul.mubr.bf16.vlgmr.msra.gmra.mrb[4].mxu0 %v456_v35 }
 0x311   : > { %v560_v37 = vpop.f32.mrb[4].mxu0 }
 0x312   : > { %v561_v38 = vadd.f32 %v709_v36, %v560_v37  ;;  %v786_v39 = vpop.f32.mrb[5].mxu0 }
 0x313   : > { %v563_v40 = vpop.f32.mrb[6].mxu0 }
 0x314   : > { %v566_v41 = vmax.f32 %v561_v38, 0.0  ;;  %v787_v42 = vpop.f32.mrb[7].mxu0 }
 0x316   : > { %v567_v43 = vpack.c.bf16 %v566_v41, %v566_v41 }
 0x318   : > { %569 = vst.msk [vmem:[%s283_s9] sm:$0xf] %vm568_vm2, %v567_v43 }
 0x319   : > { %1013 = shalt.err (!%p1010_p4)
}
 0x31a   : > { %s1014_s6 = scalar_lea.hbm %s1364_s28, 64  ;;  %s1018_s15 = scalar_lea.hbm %s1413_s5, 128 }
 0x31b   : > { %p1015_p0 = scmp.ne.s32.totalorder %s1364_s28, %s1014_s6  ;;  %p1019_p11 = scmp.lt.u32.totalorder %s1364_s28, %s1413_s5 }
 0x31c   : > { %p1020_p13 = scmp.lt.u32.totalorder %s1018_s15, %s1014_s6  ;;  %p1022_p10 = scmp.lt.u32.totalorder %s1014_s6, %s1364_s28 }
 0x31d   : > { %p1016_p9 = pnand %p1015_p0, %p1269_p5 }
 0x31e   : > { %p1021_p6 = por %p1020_p13, %p1019_p11 }
 0x31f   : > { %p1017_p8 = pneg %p1016_p9 }
 0x320   : > { %p1023_p3 = por %p1022_p10, %p1021_p6 }
 0x322   : > { %p1024_p7 = pnand %p1023_p3, %p1017_p8 }
 0x324   : > { %1027 = shalt.err (!%p1024_p7)
}
 0x325   : > { %802 = dma.vmem_to_hbm [thread:$0]  (%p1269_p5), %s1366_s23, 64, %s1364_s28, %s571_s29  }
 0x326 PF: > { %s596_s8 = sand.u32 1, %s1062_s18   ;;  %p1431_p12 = scmp.ne.s32.totalorder %s1418_s25, 0 }
 0x327   : > { %p1432_p1 = scmp.ge.s32.totalorder %s1074_s21, 2  ;;  %s597_s9 = scalar_lea.sflag [#allocation4], %s596_s8 }
 0x329   : > { %p819_p2 = pnand %p1432_p1, %p1431_p12 }
 0x32b   : > { %1057 = dma.done.wait (!%p819_p2), %s597_s9, 64  }
 0x32c   : > { %1059 = vsyncadd (!%p819_p2), %s597_s9, 4294967232  ;;  %p20_p4 = scmp.ge.s32.totalorder %s1255_s14, 4   ;;  %s1433_s18 = smov %s1066_s19 }
 0x32d   : > { %s1434_s19 = smov %s1070_s20  ;;  %s1435_s20 = smov %s1265_s30 }
 0x32e   : > { %s1436_s21 = smov %s1255_s14  ;;  %22 = sbr.rel (!%p20_p4) target bundleno = 7 (0x7), region = 97 }
 0x335   :  { %602 = vsyncpa [#allocation3], 1 }
 0x336   :  { %604 = vsyncpa [#allocation3 + $0x1], 1 }
 0x337   :  { %605 = vsyncpa [#allocation6], 1 }
 0x338   :  { %606 = vsyncpa [#allocation9], 1 }
 0x339   :  { %607 = vsyncpa [#allocation4], 1 }
 0x33a   :  { %609 = vsyncpa [#allocation4 + $0x1], 1 }

</bundles_post_ra>
